<compile_context>
chip_gen: v5e
topology: v5e:2x2
jax: 0.10.0
libtpu: 0.0.40
codegen_flags: <defaults>
</compile_context>

<pallas_src>
import math
import functools

import jax
import jax.numpy as jnp
from jax import lax
from jax.experimental import pallas as pl
from jax.experimental.pallas import tpu as pltpu


_TARGET_BLOCK_BYTES = 4 << 20      # ~4 MiB block; x4 resident (in+out, dbl-buffered)
_VMEM_LIMIT_BYTES = 32 << 20       # safe on v5e/v6e (128 MiB phys) and v7x (64 MiB phys)
_MAX_LANE = 32768                  # cap lane width so min block stays ~1 MiB
_SMALL_TOTAL_BYTES = 2 << 20       # below this, a single full block is best


def _activate_kernel(x_ref, o_ref, *, activate_fun: str):
    x = x_ref[...]
    if activate_fun == "relu":
        # Scalar constant (no block-shaped zeros broadcast materialized).
        o_ref[...] = jnp.maximum(x, 0)
    elif activate_fun == "gelu":
        # Exact (erf-based) GELU, matching the PyTorch module.  erf stays in
        # f32 for accuracy; the outer gate multiply runs in the native dtype
        # (packed bf16 on v6e/v7x => fewer VALU slots).
        xf = x.astype(jnp.float32)
        erf_t = lax.erf(xf * (1.0 / math.sqrt(2.0)))
        gate = ((erf_t + 1.0) * 0.5).astype(x.dtype)
        o_ref[...] = (x * gate).astype(o_ref.dtype)
    else:
        raise ValueError(f"unsupported activate_fun: {activate_fun}")


def _min_sublane_for_dtype(dtype) -> int:
    itemsize = jnp.dtype(dtype).itemsize
    return {4: 8, 2: 16, 1: 32}.get(itemsize, 8)


def _pick_lane(n: int, min_sub: int) -> int:
    """Largest lane width (multiple of 128, divisor of n, <= _MAX_LANE),
    preferring widths that keep rows >= the sublane tile."""
    best_any = 128
    best_good = 0
    lane = 128
    limit = min(n, _MAX_LANE)
    while lane <= limit:
        if n % lane == 0:
            best_any = lane
            if (n // lane) >= min_sub:
                best_good = lane
        lane += 128
    return best_good if best_good else best_any


def _lane_dense_view(x: jax.Array):
    """Flatten x into a lane-dense 2-D slab (last dim a multiple of 128).

    Returns (x2d, pad_elems).  If the element count is not a multiple of 128
    the flattened array is padded (one-time copy) and the caller slices the
    padding off the result.
    """
    n = x.size
    min_sub = _min_sublane_for_dtype(x.dtype)
    flat = x.reshape(-1)
    pad = 0
    if n % 128 != 0:
        pad = 128 - (n % 128)
        flat = jnp.pad(flat, (0, pad))
        n += pad
    lane = _pick_lane(n, min_sub)
    return flat.reshape(-1, lane), pad


def _choose_row_tile(rows: int, cols: int, dtype) -> int:
    """Row tile: ~4 MiB blocks, sublane-aligned, >=2 grid steps for big inputs."""
    min_sub = _min_sublane_for_dtype(dtype)
    itemsize = jnp.dtype(dtype).itemsize
    row_bytes = max(1, cols * itemsize)
    total_bytes = rows * row_bytes

    # Small inputs (or too few rows to split): one full block wins — per-step
    # overhead (~0.35 us) would dominate any split.
    if total_bytes <= _SMALL_TOTAL_BYTES or rows < 2 * min_sub:
        return rows

    t = (_TARGET_BLOCK_BYTES // row_bytes) // min_sub * min_sub
    t = max(min_sub, min(t, rows))

    # Guarantee >= 2 grid steps so DMA double-buffering overlaps and the
    # "parallel" axis can shard across v7x's two TensorCores.
    if t >= rows:
        t = pl.cdiv(pl.cdiv(rows, 2), min_sub) * min_sub
    return t


def activate_fun(x: jax.Array, activate_fun: str = "gelu") -> jax.Array:
    """Pallas TPU implementation of ActivateFun.forward (relu / gelu)."""
    if activate_fun not in ("relu", "gelu"):
        raise ValueError(f"unsupported activate_fun: {activate_fun}")

    orig_shape = x.shape
    if x.size == 0:
        # Zero-sized input: nothing to do (avoid a 0-step grid).
        return x

    x2d, pad = _lane_dense_view(x)
    rows, cols = x2d.shape
    row_tile = _choose_row_tile(rows, cols, x.dtype)

    kernel = functools.partial(_activate_kernel, activate_fun=activate_fun)

    out2d = pl.pallas_call(
        kernel,
        out_shape=jax.ShapeDtypeStruct((rows, cols), x.dtype),
        grid=(pl.cdiv(rows, row_tile),),
        in_specs=[pl.BlockSpec((row_tile, cols), lambda i: (i, 0))],
        out_specs=pl.BlockSpec((row_tile, cols), lambda i: (i, 0)),
        compiler_params=pltpu.CompilerParams(
            # "parallel": lets the runtime shard grid steps across v7x's two
            # TensorCores; no measured downside on single-TC v5e/v6e.
            dimension_semantics=("parallel",),
            # Explicitly allow 32 MiB scoped VMEM so 4 MiB blocks (x4 resident)
            # are safe even on v5e's 16 MiB scoped default.
            vmem_limit_bytes=_VMEM_LIMIT_BYTES,
        ),
    )(x2d)

    out_flat = out2d.reshape(-1)
    if pad:
        out_flat = out_flat[: x.size]
    return out_flat.reshape(orig_shape)


def _gelu_ref(x):
    xf = x.astype(jnp.float32)
    return (xf * 0.5 * (1.0 + lax.erf(xf / math.sqrt(2.0)))).astype(x.dtype)


if __name__ == "__main__":
    key = jax.random.PRNGKey(0)
    k1, k2, k3, k4 = jax.random.split(key, 4)

    # --- f32, lane-dense path (total elements a multiple of 128) ---
    x_f32 = jax.random.normal(k1, (2, 8, 128), dtype=jnp.float32)

    y_gelu = jax.block_until_ready(activate_fun(x_f32, "gelu"))
    assert y_gelu.shape == x_f32.shape and y_gelu.dtype == x_f32.dtype
    assert jnp.allclose(y_gelu, _gelu_ref(x_f32), atol=1e-5, rtol=1e-5)

    y_relu = jax.block_until_ready(activate_fun(x_f32, "relu"))
    assert jnp.allclose(y_relu, jnp.maximum(x_f32, 0.0), atol=0.0, rtol=0.0)

    # --- bf16 path (16-row packed sublane tile, native-dtype outer mul) ---
    x_bf16 = jax.random.normal(k2, (2, 16, 256), dtype=jnp.bfloat16)
    y_bf16 = jax.block_until_ready(activate_fun(x_bf16, "gelu"))
    assert y_bf16.shape == x_bf16.shape and y_bf16.dtype == x_bf16.dtype
    assert jnp.allclose(
        y_bf16.astype(jnp.float32),
        _gelu_ref(x_bf16).astype(jnp.float32),
        atol=2e-2,
        rtol=2e-2,
    )

    # --- ragged / non-128-multiple element count: pad + slice path ---
    x_odd = jax.random.normal(k3, (3, 5, 96), dtype=jnp.float32)
    y_odd = jax.block_until_ready(activate_fun(x_odd, "gelu"))
    assert y_odd.shape == x_odd.shape
    assert jnp.allclose(y_odd, _gelu_ref(x_odd), atol=1e-5, rtol=1e-5)

    # --- multi-step grid with a ragged last row-block ---
    x_big = jax.random.normal(k4, (1000, 640), dtype=jnp.float32)
    y_big = jax.block_until_ready(activate_fun(x_big, "gelu"))
    assert y_big.shape == x_big.shape
    assert jnp.allclose(y_big, _gelu_ref(x_big), atol=1e-5, rtol=1e-5)
    y_big_relu = jax.block_until_ready(activate_fun(x_big, "relu"))
    assert jnp.allclose(y_big_relu, jnp.maximum(x_big, 0.0), atol=0.0, rtol=0.0)

    print("KERNEL_OK")
</pallas_src>

<mosaic_0001>
module attributes {stable_mosaic.version = 11 : i64} {
  func.func @_activate_kernel(%arg0: i32, %arg1: memref<8x256xf32, #tpu.memory_space<vmem>>, %arg2: memref<8x256xf32, #tpu.memory_space<vmem>>) attributes {dimension_semantics = [#tpu.dimension_semantics<parallel>], iteration_bounds = array<i64: 1>, scalar_prefetch = 0 : i64, scratch_operands = 0 : i64, tpu.core_type = #tpu.core_type<tc>, window_params = [{transform_indices = @transform_0, window_bounds = array<i64: 8, 256>}, {transform_indices = @transform_1, window_bounds = array<i64: 8, 256>}]} {
    %c0 = arith.constant 0 : index
    %c0_0 = arith.constant 0 : index
    %0 = vector.load %arg1[%c0, %c0_0] : memref<8x256xf32, #tpu.memory_space<vmem>>, vector<8x256xf32>
    %cst = arith.constant 0.707106769 : f32
    %1 = vector.broadcast %cst : f32 to vector<8x256xf32>
    %2 = arith.mulf %0, %1 : vector<8x256xf32>
    %3 = math.erf %2 : vector<8x256xf32>
    %cst_1 = arith.constant 1.000000e+00 : f32
    %4 = vector.broadcast %cst_1 : f32 to vector<8x256xf32>
    %5 = arith.addf %3, %4 : vector<8x256xf32>
    %cst_2 = arith.constant 5.000000e-01 : f32
    %6 = vector.broadcast %cst_2 : f32 to vector<8x256xf32>
    %7 = arith.mulf %5, %6 : vector<8x256xf32>
    %8 = arith.mulf %0, %7 : vector<8x256xf32>
    %c0_3 = arith.constant 0 : index
    %c0_4 = arith.constant 0 : index
    %9 = vector.load %arg2[%c0_3, %c0_4] : memref<8x256xf32, #tpu.memory_space<vmem>>, vector<8x256xf32>
    tpu.vector_store %arg2[%c0_3, %c0_4], %8 {strides = array<i32>} : memref<8x256xf32, #tpu.memory_space<vmem>>, vector<8x256xf32>,
    return
  }
  func.func @transform_0(%arg0: i32) -> (i32, i32) {
    %c0_i32 = arith.constant 0 : i32
    %c0_i32_0 = arith.constant 0 : i32
    return %arg0, %c0_i32 : i32, i32
  }
  func.func @transform_1(%arg0: i32) -> (i32, i32) {
    %c0_i32 = arith.constant 0 : i32
    %c0_i32_0 = arith.constant 0 : i32
    return %arg0, %c0_i32 : i32, i32
  }
}

</mosaic_0001>

<bundles_post_ra>
// kernel: tpu_custom_call.1
= control target key start
LH: loop header
LB: loop body
LE: loop exit
PB: predicated region body
PF: predicated region fallthrough
CT: control target
= control target key end

     0   :  { %6 = vsyncpa [#allocation3], 0  ;;  %s228_s0 = inlined_call_operand.hbm [shape: f32[8,256], index: 0, kind: input, shape index: {}]   ;;  %s229_s1 = inlined_call_operand.hbm [shape: f32[8,256], index: 1, kind: output, shape index: {}]  }
   0x1   :  { %7 = vsyncpa [#allocation4], 0  ;;  %s13_s8 = sshll.u32 %s228_s0, 4  ;;  %s192_s9 = smov [#allocation2]   ;;  %s14_s8 = int_to_ptr.hbm [resolvable:$true] %s13_s8 }
   0x2   :  { %s15_s10 = sshll.u32 %s192_s9, 4  ;;  %s16_s10 = int_to_ptr.vmem [resolvable:$true] %s15_s10 }
   0x3   :  { %18 = dma.hbm_to_vmem [thread:$0]  %s14_s8, 256, %s16_s10, [#allocation3]  }
   0x4   :  { %188 = dma.done.wait [#allocation3], 256  }
   0x5   :  { %189 = vsyncadd [#allocation3], 4294967040  ;;  %v207_v0 = vld [vmem:[#allocation2] sm:$0xff]  ;;  %v209_v1 = vld [vmem:[#allocation2 + $0x8] sm:$0xff]  ;;  %s193_s0 = smov [#allocation5]   ;;  %s122_s14 = sshll.u32 %s229_s1, 4  ;;  %s123_s14 = int_to_ptr.hbm [resolvable:$true] %s122_s14 }
   0x6   :  { %v212_v2 = vmul.f32 0.70710677, %v207_v0  ;;  %v215_v3 = vmul.f32 0.70710677, %v209_v1  ;;  %s120_s11 = sshll.u32 %s193_s0, 4  ;;  %s121_s11 = int_to_ptr.vmem [resolvable:$true] %s120_s11 }
   0x8   :  { %v27_v4 = vmul.f32 %v212_v2, %v212_v2  ;;  %v67_v5 = vmul.f32 %v215_v3, %v215_v3 }
   0xa   :  { %v28_v6 = vmin.f32 %v27_v4, 16.0  ;;  %v68_v7 = vmin.f32 %v67_v5, 16.0 }
   0xc   :  { %v29_v8 = vmul.f32 2.1237322e-06, %v28_v6  ;;  %v40_v9 = vmul.f32 3.8918573e-05, %v28_v6  ;;  %v69_v10 = vmul.f32 2.1237322e-06, %v68_v7 }
   0xd   :  { %v80_v11 = vmul.f32 3.8918573e-05, %v68_v7 }
   0xe   :  { %v30_v12 = vadd.f32 0.00028619796, %v29_v8  ;;  %v41_v13 = vadd.f32 0.001143296, %v40_v9  ;;  %v70_v14 = vadd.f32 0.00028619796, %v69_v10 }
   0xf   :  { %v81_v15 = vadd.f32 0.001143296, %v80_v11 }
  0x10   :  { %v31_v16 = vmul.f32 %v30_v12, %v28_v6  ;;  %v42_v17 = vmul.f32 %v41_v13, %v28_v6  ;;  %v71_v18 = vmul.f32 %v70_v14, %v68_v7 }
  0x11   :  { %v82_v19 = vmul.f32 %v81_v15, %v68_v7 }
  0x12   :  { %v32_v20 = vadd.f32 0.0036580483, %v31_v16  ;;  %v43_v21 = vadd.f32 0.014752088, %v42_v17  ;;  %v72_v22 = vadd.f32 0.0036580483, %v71_v18 }
  0x13   :  { %v83_v23 = vadd.f32 0.014752088, %v82_v19 }
  0x14   :  { %v33_v24 = vmul.f32 %v32_v20, %v28_v6  ;;  %v44_v25 = vmul.f32 %v43_v21, %v28_v6  ;;  %v73_v26 = vmul.f32 %v72_v22, %v68_v7 }
  0x15   :  { %v84_v27 = vmul.f32 %v83_v23, %v68_v7 }
  0x16   :  { %v45_v28 = vadd.f32 0.112945676, %v44_v25  ;;  %v34_v29 = vadd.f32 0.05243302, %v33_v24  ;;  %v74_v32 = vadd.f32 0.05243302, %v73_v26 }
  0x17   :  { %v85_v30 = vadd.f32 0.112945676, %v84_v27 }
  0x18   :  { %v46_v31 = vmul.f32 %v45_v28, %v28_v6  ;;  %v35_v35 = vmul.f32 %v34_v29, %v28_v6  ;;  %v75_v38 = vmul.f32 %v74_v32, %v68_v7 }
  0x19   :  { %v86_v33 = vmul.f32 %v85_v30, %v68_v7 }
  0x1a   :  { %v47_v34 = vadd.f32 0.4994258, %v46_v31  ;;  %v36_v41 = vadd.f32 0.18741608, %v35_v35  ;;  %v76_v43 = vadd.f32 0.18741608, %v75_v38 }
  0x1b   :  { %v87_v36 = vadd.f32 0.4994258, %v86_v33 }
  0x1c   :  { %v48_v37 = vmul.f32 %v47_v34, %v28_v6  ;;  %v37_v44 = vmul.f32 %v36_v41, %v28_v6  ;;  %v77_v45 = vmul.f32 %v76_v43, %v68_v7 }
  0x1d   :  { %v88_v39 = vmul.f32 %v87_v36, %v68_v7 }
  0x1e   :  { %v49_v40 = vadd.f32 1.0, %v48_v37  ;;  %v38_v48 = vadd.f32 1.1283791, %v37_v44  ;;  %v78_v51 = vadd.f32 1.1283791, %v77_v45 }
  0x1f   :  { %v89_v42 = vadd.f32 1.0, %v88_v39 }
  0x20   :  { %136 = vrcp.f32 %v49_v40  ;;  %vm55_vm0 = vweird.f32 %v49_v40  ;;  %v61_v50 = vand.u32 2147483648, %v49_v40  ;;  %v59_v54 = vand.u32 2147483647, %v49_v40 }
  0x21   :  { %138 = vrcp.f32 %v89_v42  ;;  %v101_v55 = vand.u32 2147483648, %v89_v42  ;;  %vm95_vm2 = vweird.f32 %v89_v42  ;;  %v99_v57 = vand.u32 2147483647, %v89_v42 }
  0x22   :  { %v62_v59 = vor.u32 1.1754944e-38, %v61_v50  ;;  %v39_v61 = vmul.f32 %v38_v48, %v212_v2  ;;  %vm60_vm5 = vcmp.eq.f32.partialorder %v59_v54, 8.507059e+37  ;;  %v79_v4 = vmul.f32 %v78_v51, %v215_v3 }
  0x23   :  { %v102_v63 = vor.u32 1.1754944e-38, %v101_v55  ;;  %vm100_vm7 = vcmp.eq.f32.partialorder %v99_v57, 8.507059e+37 }
  0x26   :  { %v137_v46 = vpop.eup %136 }
  0x27   :  { %v139_v47 = vpop.eup %138  ;;  %v51_v49 = vmul.f32 %v137_v46, %v49_v40  ;;  %vm56_vm1 = vweird.f32 %v137_v46 }
  0x28   :  { %v91_v52 = vmul.f32 %v139_v47, %v89_v42  ;;  %vm96_vm3 = vweird.f32 %v139_v47  ;;  %vm57_vm4 = vmor %vm55_vm0, %vm56_vm1 }
  0x29   :  { %v52_v53 = vsub.f32 1.0, %v51_v49  ;;  %vm97_vm6 = vmor %vm95_vm2, %vm96_vm3 }
  0x2a   :  { %v92_v56 = vsub.f32 1.0, %v91_v52 }
  0x2b   :  { %v53_v58 = vmul.f32 %v137_v46, %v52_v53 }
  0x2c   :  { %v93_v60 = vmul.f32 %v139_v47, %v92_v56 }
  0x2d   :  { %v54_v62 = vadd.f32 %v137_v46, %v53_v58 }
  0x2e   :  { %v94_v5 = vadd.f32 %v139_v47, %v93_v60 }
  0x2f   :  { %v58_v6 = vsel %vm57_vm4, %v137_v46, %v54_v62 }
  0x30   :  { %v63_v7 = vsel %vm60_vm5, %v62_v59, %v58_v6  ;;  %v98_v8 = vsel %vm97_vm6, %v139_v47, %v94_v5 }
  0x31   :  { %v64_v9 = vmul.f32 %v63_v7, %v39_v61  ;;  %v103_v10 = vsel %vm100_vm7, %v102_v63, %v98_v8 }
  0x32   :  { %v104_v11 = vmul.f32 %v103_v10, %v79_v4 }
  0x33   :  { %v132_v12 = vclamps-f32 %v64_v9, 1.0 }
  0x34   :  { %v133_v13 = vclamps-f32 %v104_v11, 1.0 }
  0x35   :  { %v107_v14 = vadd.f32 1.0, %v132_v12 }
  0x36   :  { %v108_v15 = vadd.f32 1.0, %v133_v13 }
  0x37   :  { %v109_v16 = vmul.f32 0.5, %v107_v14 }
  0x38   :  { %v110_v2 = vmul.f32 0.5, %v108_v15 }
  0x39   :  { %v111_v3 = vmul.f32 %v109_v16, %v207_v0 }
  0x3a   :  { %v112_v17 = vmul.f32 %v110_v2, %v209_v1 }
  0x3b   :  { %113 = vst [vmem:[#allocation5] sm:$0xff] %v111_v3 }
  0x3c   :  { %114 = vst [vmem:[#allocation5 + $0x8] sm:$0xff] %v112_v17 }
  0x3d   :  { %125 = dma.vmem_to_hbm [thread:$0]  %s121_s11, 256, %s123_s14, [#allocation4]  }
  0x3e   :  { %190 = dma.done.wait [#allocation4], 256  }
  0x3f   :  { %191 = vsyncadd [#allocation4], 4294967040 }
  0x40   :  { %130 = vsyncpa [#allocation3], 1 }
  0x41   :  { %131 = vsyncpa [#allocation4], 1 }

</bundles_post_ra>
